<compile_context>
chip_gen: v6e
topology: v6e:2x2x1
jax: 0.10.0
libtpu: 0.0.40
codegen_flags: <defaults>
</compile_context>

<pallas_src>
import functools

import jax
import jax.numpy as jnp
import numpy as np
from jax.experimental import pallas as pl
from jax.experimental.pallas import tpu as pltpu


def _lane_pad(n, lanes=128):
    return max(lanes, ((n + lanes - 1) // lanes) * lanes)


def _make_kernel(inv_s_enc):
    """Per-batch kernel: embeds, runs the synthetic forecaster, projects, and
    emits the padded predictions plus this batch's sum of squared errors."""

    def kernel(enc_ref, dec_ref, y_ref,
               w_enc_ref, b_enc_ref, w_dec_ref, b_dec_ref,
               w_f1_ref, b_f1_ref, w_f2_ref, b_f2_ref,
               w_prj_ref, b_prj_ref,
               out_ref, sse_ref):
        enc = enc_ref[...]                                    # (S_enc, in)
        dec = dec_ref[...]                                    # (pred_len, in)

        # Embeddings (separate matmuls per stream; no packed weights).
        enc_emb = jnp.dot(enc, w_enc_ref[...],
                          preferred_element_type=jnp.float32) + b_enc_ref[...]
        dec_emb = jnp.dot(dec, w_dec_ref[...],
                          preferred_element_type=jnp.float32) + b_dec_ref[...]

        # Synthetic forecasting model: per-token FFN + per-batch mean-pooled
        # encoder context added to the decoder stream.
        enc_out = jnp.maximum(
            jnp.dot(enc_emb, w_f1_ref[...],
                    preferred_element_type=jnp.float32) + b_f1_ref[...], 0.0)
        ctx = jnp.sum(enc_out, axis=0, keepdims=True) * inv_s_enc      # (1, D)

        dec_hidden = jnp.maximum(
            jnp.dot(dec_emb, w_f2_ref[...],
                    preferred_element_type=jnp.float32) + b_f2_ref[...], 0.0) + ctx

        # Final projection into lane-padded (128-wide) output space.
        final = jnp.dot(dec_hidden, w_prj_ref[...],
                        preferred_element_type=jnp.float32) + b_prj_ref[...]
        out_ref[...] = final.astype(out_ref.dtype)

        # Fused per-batch sum of squared errors.  y is zero-padded in the
        # extra lanes and `final` is exactly zero there (zero-padded weights),
        # so summing the whole padded block equals the real-lane sum.
        diff = y_ref[...] - final
        sse = jnp.sum(diff * diff)
        sse_ref[...] = jnp.full(sse_ref.shape, sse, dtype=jnp.float32)

    return kernel


def pack_params(params):
    """One-time (load-time) re-packing: lane-pad the projection to 128 lanes."""
    d_model, out_size = params["w_proj"].shape
    out_pad = _lane_pad(out_size)
    w_proj_pad = jnp.zeros((d_model, out_pad), jnp.float32)
    w_proj_pad = w_proj_pad.at[:, :out_size].set(params["w_proj"])
    b_proj_pad = jnp.zeros((1, out_pad), jnp.float32)
    b_proj_pad = b_proj_pad.at[:, :out_size].set(params["b_proj"][0])

    packed = dict(params)
    packed["w_proj_pad"] = w_proj_pad
    packed["b_proj_pad"] = b_proj_pad
    return packed


def forecast_blur_denoise_forward(packed, enc_inputs, dec_inputs, y_true=None,
                                  *, pred_len):
    """Pallas implementation of ForecastBlurDenoise.forward (eval path)."""
    B, S_enc, in_size = enc_inputs.shape
    d_model, out_size = packed["w_proj"].shape
    out_pad = packed["w_proj_pad"].shape[1]

    enc = enc_inputs.astype(jnp.float32)
    dec_tail = dec_inputs[:, -pred_len:, :].astype(jnp.float32)   # only the tail is needed

    if y_true is not None:
        y_pad = jnp.pad(y_true.astype(jnp.float32),
                        ((0, 0), (0, 0), (0, out_pad - out_size)))
    else:
        y_pad = jnp.zeros((B, pred_len, out_pad), jnp.float32)

    kernel = _make_kernel(1.0 / float(S_enc))

    def pinned(shape):
        # Grid-invariant operand: constant index_map -> DMA'd once.
        return pl.BlockSpec(shape, lambda b, _n=len(shape): (0,) * _n)

    weight_ops = [
        packed["w_enc"], packed["b_enc"], packed["w_dec"], packed["b_dec"],
        packed["w_f1"], packed["b_f1"], packed["w_f2"], packed["b_f2"],
        packed["w_proj_pad"], packed["b_proj_pad"],
    ]

    # Advisory cost estimate (helps XLA schedule neighbors around the call).
    mm_flops = 2 * B * (S_enc * in_size * d_model + pred_len * in_size * d_model
                        + S_enc * d_model * d_model + pred_len * d_model * d_model
                        + pred_len * d_model * out_pad)
    vec_flops = B * (3 * S_enc * d_model + 5 * pred_len * d_model
                     + 4 * pred_len * out_pad)
    bytes_accessed = 4 * (enc.size + dec_tail.size + y_pad.size
                          + sum(int(w.size) for w in weight_ops)
                          + B * pred_len * out_pad + B * 8 * 128)
    cost = pl.CostEstimate(flops=int(mm_flops + vec_flops), transcendentals=0,
                           bytes_accessed=int(bytes_accessed))

    grid_spec = pltpu.PrefetchScalarGridSpec(
        num_scalar_prefetch=0,
        grid=(B,),                                   # one batch element per step
        in_specs=[
            pl.BlockSpec((None, S_enc, in_size), lambda b: (b, 0, 0)),
            pl.BlockSpec((None, pred_len, in_size), lambda b: (b, 0, 0)),
            pl.BlockSpec((None, pred_len, out_pad), lambda b: (b, 0, 0)),
        ] + [pinned(w.shape) for w in weight_ops],
        out_specs=(
            pl.BlockSpec((None, pred_len, out_pad), lambda b: (b, 0, 0)),
            pl.BlockSpec((None, 8, 128), lambda b: (b, 0, 0)),
        ),
    )

    out_pad_arr, sse = pl.pallas_call(
        kernel,
        out_shape=(jax.ShapeDtypeStruct((B, pred_len, out_pad), jnp.float32),
                   jax.ShapeDtypeStruct((B, 8, 128), jnp.float32)),
        grid_spec=grid_spec,
        compiler_params=pltpu.CompilerParams(
            dimension_semantics=("parallel",),        # megacore-shardable
            vmem_limit_bytes=16 * 1024 * 1024,        # explicit, fits every gen
        ),
        cost_estimate=cost,
    )(enc, dec_tail, y_pad, *weight_ops)

    final_outputs = out_pad_arr[..., :out_size]

    if y_true is not None:
        # Two-stage reduction: per-batch SSE in-kernel, tiny sum over B here.
        mse = jnp.sum(sse[:, 0, 0]) / float(B * pred_len * out_size)
        mll_error = jnp.float32(0.0)                  # GP branch not taken in eval
        loss = mse + packed["lam"][0] * mll_error
    else:
        loss = jnp.float32(0.0)
    return final_outputs, loss


def _reference_forward(params, enc_inputs, dec_inputs, y_true, pred_len):
    enc_emb = enc_inputs @ params["w_enc"] + params["b_enc"]
    dec_emb = dec_inputs @ params["w_dec"] + params["b_dec"]
    enc_out = jnp.maximum(enc_emb @ params["w_f1"] + params["b_f1"], 0.0)
    ctx = jnp.mean(enc_out, axis=1, keepdims=True)
    dec_out = jnp.maximum(dec_emb @ params["w_f2"] + params["b_f2"], 0.0) + ctx
    final = dec_out[:, -pred_len:, :] @ params["w_proj"] + params["b_proj"]
    loss = jnp.mean((y_true - final) ** 2) + params["lam"][0] * 0.0
    return final, loss


def make_params(key, input_size, d_model, output_size):
    ks = jax.random.split(key, 12)
    return {
        "w_enc": jax.random.normal(ks[0], (input_size, d_model), jnp.float32) * 0.1,
        "b_enc": jax.random.normal(ks[1], (1, d_model), jnp.float32) * 0.01,
        "w_dec": jax.random.normal(ks[2], (input_size, d_model), jnp.float32) * 0.1,
        "b_dec": jax.random.normal(ks[3], (1, d_model), jnp.float32) * 0.01,
        "w_f1": jax.random.normal(ks[4], (d_model, d_model), jnp.float32) * 0.1,
        "b_f1": jax.random.normal(ks[5], (1, d_model), jnp.float32) * 0.01,
        "w_f2": jax.random.normal(ks[6], (d_model, d_model), jnp.float32) * 0.1,
        "b_f2": jax.random.normal(ks[7], (1, d_model), jnp.float32) * 0.01,
        "w_proj": jax.random.normal(ks[8], (d_model, output_size), jnp.float32) * 0.1,
        "b_proj": jax.random.normal(ks[9], (1, output_size), jnp.float32) * 0.01,
        "lam": jax.random.normal(ks[10], (1,), jnp.float32),
    }


if __name__ == "__main__":
    B, S_enc, S_dec = 2, 16, 8
    input_size, d_model, output_size, pred_len = 16, 32, 8, 4

    key = jax.random.PRNGKey(0)
    k_p, k_e, k_d, k_y = jax.random.split(key, 4)

    params = make_params(k_p, input_size, d_model, output_size)
    packed = pack_params(params)              # one-time weight packing / padding
    enc_inputs = jax.random.normal(k_e, (B, S_enc, input_size), jnp.float32)
    dec_inputs = jax.random.normal(k_d, (B, S_dec, input_size), jnp.float32)
    y_true = jax.random.normal(k_y, (B, pred_len, output_size), jnp.float32)

    fwd = jax.jit(functools.partial(forecast_blur_denoise_forward,
                                    pred_len=pred_len))
    final_outputs, loss = fwd(packed, enc_inputs, dec_inputs, y_true)
    final_outputs = jax.block_until_ready(final_outputs)
    loss = jax.block_until_ready(loss)

    ref_out, ref_loss = _reference_forward(params, enc_inputs, dec_inputs,
                                           y_true, pred_len)
    np.testing.assert_allclose(np.asarray(final_outputs), np.asarray(ref_out),
                               rtol=1e-5, atol=1e-5)
    np.testing.assert_allclose(np.asarray(loss), np.asarray(ref_loss),
                               rtol=1e-5, atol=1e-5)
    print("KERNEL_OK")
</pallas_src>

<mosaic_0001>
module attributes {stable_mosaic.version = 11 : i64} {
  func.func @kernel(%arg0: i32, %arg1: memref<1x16x16xf32, #tpu.memory_space<vmem>>, %arg2: memref<1x4x16xf32, #tpu.memory_space<vmem>>, %arg3: memref<1x4x128xf32, #tpu.memory_space<vmem>>, %arg4: memref<16x32xf32, #tpu.memory_space<vmem>>, %arg5: memref<1x32xf32, #tpu.memory_space<vmem>>, %arg6: memref<16x32xf32, #tpu.memory_space<vmem>>, %arg7: memref<1x32xf32, #tpu.memory_space<vmem>>, %arg8: memref<32x32xf32, #tpu.memory_space<vmem>>, %arg9: memref<1x32xf32, #tpu.memory_space<vmem>>, %arg10: memref<32x32xf32, #tpu.memory_space<vmem>>, %arg11: memref<1x32xf32, #tpu.memory_space<vmem>>, %arg12: memref<32x128xf32, #tpu.memory_space<vmem>>, %arg13: memref<1x128xf32, #tpu.memory_space<vmem>>, %arg14: memref<1x4x128xf32, #tpu.memory_space<vmem>>, %arg15: memref<1x8x128xf32, #tpu.memory_space<vmem>>) attributes {dimension_semantics = [#tpu.dimension_semantics<parallel>], iteration_bounds = array<i64: 2>, scalar_prefetch = 0 : i64, scratch_operands = 0 : i64, tpu.core_type = #tpu.core_type<tc>, window_params = [{transform_indices = @transform_0, window_bounds = array<i64: 1, 16, 16>}, {transform_indices = @transform_1, window_bounds = array<i64: 1, 4, 16>}, {transform_indices = @transform_2, window_bounds = array<i64: 1, 4, 128>}, {pipeline_mode = #tpu.pipeline_mode<synchronous>, transform_indices = @transform_3, window_bounds = array<i64: 16, 32>}, {pipeline_mode = #tpu.pipeline_mode<synchronous>, transform_indices = @transform_4, window_bounds = array<i64: 1, 32>}, {pipeline_mode = #tpu.pipeline_mode<synchronous>, transform_indices = @transform_5, window_bounds = array<i64: 16, 32>}, {pipeline_mode = #tpu.pipeline_mode<synchronous>, transform_indices = @transform_6, window_bounds = array<i64: 1, 32>}, {pipeline_mode = #tpu.pipeline_mode<synchronous>, transform_indices = @transform_7, window_bounds = array<i64: 32, 32>}, {pipeline_mode = #tpu.pipeline_mode<synchronous>, transform_indices = @transform_8, window_bounds = array<i64: 1, 32>}, {pipeline_mode = #tpu.pipeline_mode<synchronous>, transform_indices = @transform_9, window_bounds = array<i64: 32, 32>}, {pipeline_mode = #tpu.pipeline_mode<synchronous>, transform_indices = @transform_10, window_bounds = array<i64: 1, 32>}, {pipeline_mode = #tpu.pipeline_mode<synchronous>, transform_indices = @transform_11, window_bounds = array<i64: 32, 128>}, {pipeline_mode = #tpu.pipeline_mode<synchronous>, transform_indices = @transform_12, window_bounds = array<i64: 1, 128>}, {transform_indices = @transform_13, window_bounds = array<i64: 1, 4, 128>}, {transform_indices = @transform_14, window_bounds = array<i64: 1, 8, 128>}]} {
    %c0 = arith.constant 0 : index
    %c0_0 = arith.constant 0 : index
    %c0_1 = arith.constant 0 : index
    %0 = vector.load %arg1[%c0, %c0_0, %c0_1] : memref<1x16x16xf32, #tpu.memory_space<vmem>>, vector<1x16x16xf32>
    %1 = vector.shape_cast %0 : vector<1x16x16xf32> to vector<16x16xf32>
    %c0_2 = arith.constant 0 : index
    %c0_3 = arith.constant 0 : index
    %c0_4 = arith.constant 0 : index
    %2 = vector.load %arg2[%c0_2, %c0_3, %c0_4] : memref<1x4x16xf32, #tpu.memory_space<vmem>>, vector<1x4x16xf32>
    %3 = vector.shape_cast %2 : vector<1x4x16xf32> to vector<4x16xf32>
    %c0_5 = arith.constant 0 : index
    %c0_6 = arith.constant 0 : index
    %4 = vector.load %arg4[%c0_5, %c0_6] : memref<16x32xf32, #tpu.memory_space<vmem>>, vector<16x32xf32>
    %cst = arith.constant dense<0.000000e+00> : vector<16x32xf32>
    %5 = tpu.matmul %1, %4, %cst {dimension_numbers = #tpu.dot_dimension_numbers<[1], [0], [0], [1], [0, 0, 1, 1], [], []>} : vector<16x16xf32>, vector<16x32xf32>, vector<16x32xf32> -> vector<16x32xf32>
    %c0_7 = arith.constant 0 : index
    %c0_8 = arith.constant 0 : index
    %6 = vector.load %arg5[%c0_7, %c0_8] : memref<1x32xf32, #tpu.memory_space<vmem>>, vector<1x32xf32>
    %7 = vector.broadcast %6 : vector<1x32xf32> to vector<16x32xf32>
    %8 = arith.addf %5, %7 : vector<16x32xf32>
    %c0_9 = arith.constant 0 : index
    %c0_10 = arith.constant 0 : index
    %9 = vector.load %arg6[%c0_9, %c0_10] : memref<16x32xf32, #tpu.memory_space<vmem>>, vector<16x32xf32>
    %cst_11 = arith.constant dense<0.000000e+00> : vector<4x32xf32>
    %10 = tpu.matmul %3, %9, %cst_11 {dimension_numbers = #tpu.dot_dimension_numbers<[1], [0], [0], [1], [0, 0, 1, 1], [], []>} : vector<4x16xf32>, vector<16x32xf32>, vector<4x32xf32> -> vector<4x32xf32>
    %c0_12 = arith.constant 0 : index
    %c0_13 = arith.constant 0 : index
    %11 = vector.load %arg7[%c0_12, %c0_13] : memref<1x32xf32, #tpu.memory_space<vmem>>, vector<1x32xf32>
    %12 = vector.broadcast %11 : vector<1x32xf32> to vector<4x32xf32>
    %13 = arith.addf %10, %12 : vector<4x32xf32>
    %c0_14 = arith.constant 0 : index
    %c0_15 = arith.constant 0 : index
    %14 = vector.load %arg8[%c0_14, %c0_15] : memref<32x32xf32, #tpu.memory_space<vmem>>, vector<32x32xf32>
    %cst_16 = arith.constant dense<0.000000e+00> : vector<16x32xf32>
    %15 = tpu.matmul %8, %14, %cst_16 {dimension_numbers = #tpu.dot_dimension_numbers<[1], [0], [0], [1], [0, 0, 1, 1], [], []>} : vector<16x32xf32>, vector<32x32xf32>, vector<16x32xf32> -> vector<16x32xf32>
    %c0_17 = arith.constant 0 : index
    %c0_18 = arith.constant 0 : index
    %16 = vector.load %arg9[%c0_17, %c0_18] : memref<1x32xf32, #tpu.memory_space<vmem>>, vector<1x32xf32>
    %17 = vector.broadcast %16 : vector<1x32xf32> to vector<16x32xf32>
    %18 = arith.addf %15, %17 : vector<16x32xf32>
    %cst_19 = arith.constant 0.000000e+00 : f32
    %19 = vector.broadcast %cst_19 : f32 to vector<16x32xf32>
    %20 = arith.maximumf %18, %19 : vector<16x32xf32>
    %cst_20 = arith.constant dense<0.000000e+00> : vector<32xf32>
    %21 = vector.multi_reduction <add>, %20, %cst_20 [0] : vector<16x32xf32> to vector<32xf32>
    %22 = vector.shape_cast %21 : vector<32xf32> to vector<1x32xf32>
    %cst_21 = arith.constant 6.250000e-02 : f32
    %23 = vector.broadcast %cst_21 : f32 to vector<1x32xf32>
    %24 = arith.mulf %22, %23 : vector<1x32xf32>
    %c0_22 = arith.constant 0 : index
    %c0_23 = arith.constant 0 : index
    %25 = vector.load %arg10[%c0_22, %c0_23] : memref<32x32xf32, #tpu.memory_space<vmem>>, vector<32x32xf32>
    %cst_24 = arith.constant dense<0.000000e+00> : vector<4x32xf32>
    %26 = tpu.matmul %13, %25, %cst_24 {dimension_numbers = #tpu.dot_dimension_numbers<[1], [0], [0], [1], [0, 0, 1, 1], [], []>} : vector<4x32xf32>, vector<32x32xf32>, vector<4x32xf32> -> vector<4x32xf32>
    %c0_25 = arith.constant 0 : index
    %c0_26 = arith.constant 0 : index
    %27 = vector.load %arg11[%c0_25, %c0_26] : memref<1x32xf32, #tpu.memory_space<vmem>>, vector<1x32xf32>
    %28 = vector.broadcast %27 : vector<1x32xf32> to vector<4x32xf32>
    %29 = arith.addf %26, %28 : vector<4x32xf32>
    %cst_27 = arith.constant 0.000000e+00 : f32
    %30 = vector.broadcast %cst_27 : f32 to vector<4x32xf32>
    %31 = arith.maximumf %29, %30 : vector<4x32xf32>
    %32 = vector.broadcast %24 : vector<1x32xf32> to vector<4x32xf32>
    %33 = arith.addf %31, %32 : vector<4x32xf32>
    %c0_28 = arith.constant 0 : index
    %c0_29 = arith.constant 0 : index
    %34 = vector.load %arg12[%c0_28, %c0_29] : memref<32x128xf32, #tpu.memory_space<vmem>>, vector<32x128xf32>
    %cst_30 = arith.constant dense<0.000000e+00> : vector<4x128xf32>
    %35 = tpu.matmul %33, %34, %cst_30 {dimension_numbers = #tpu.dot_dimension_numbers<[1], [0], [0], [1], [0, 0, 1, 1], [], []>} : vector<4x32xf32>, vector<32x128xf32>, vector<4x128xf32> -> vector<4x128xf32>
    %c0_31 = arith.constant 0 : index
    %c0_32 = arith.constant 0 : index
    %36 = vector.load %arg13[%c0_31, %c0_32] : memref<1x128xf32, #tpu.memory_space<vmem>>, vector<1x128xf32>
    %37 = vector.broadcast %36 : vector<1x128xf32> to vector<4x128xf32>
    %38 = arith.addf %35, %37 : vector<4x128xf32>
    %c0_33 = arith.constant 0 : index
    %c0_34 = arith.constant 0 : index
    %c0_35 = arith.constant 0 : index
    %39 = vector.load %arg14[%c0_33, %c0_34, %c0_35] : memref<1x4x128xf32, #tpu.memory_space<vmem>>, vector<1x4x128xf32>
    %40 = vector.shape_cast %39 : vector<1x4x128xf32> to vector<4x128xf32>
    %41 = vector.shape_cast %38 : vector<4x128xf32> to vector<1x4x128xf32>
    tpu.vector_store %arg14[%c0_33, %c0_34, %c0_35], %41 {strides = array<i32>} : memref<1x4x128xf32, #tpu.memory_space<vmem>>, vector<1x4x128xf32>,
    %c0_36 = arith.constant 0 : index
    %c0_37 = arith.constant 0 : index
    %c0_38 = arith.constant 0 : index
    %42 = vector.load %arg3[%c0_36, %c0_37, %c0_38] : memref<1x4x128xf32, #tpu.memory_space<vmem>>, vector<1x4x128xf32>
    %43 = vector.shape_cast %42 : vector<1x4x128xf32> to vector<4x128xf32>
    %44 = arith.subf %43, %38 : vector<4x128xf32>
    %45 = arith.mulf %44, %44 : vector<4x128xf32>
    %46 = vector.shape_cast %45 : vector<4x128xf32> to vector<1x4x128xf32>
    %cst_39 = arith.constant dense<0.000000e+00> : vector<1xf32>
    %47 = vector.multi_reduction <add>, %46, %cst_39 [1, 2] : vector<1x4x128xf32> to vector<1xf32>
    %48 = vector.shape_cast %47 : vector<1xf32> to vector<1x1x1xf32>
    %49 = vector.extract %48[0, 0, 0] : f32 from vector<1x1x1xf32>
    %50 = vector.broadcast %49 : f32 to vector<8x128xf32>
    %c0_40 = arith.constant 0 : index
    %c0_41 = arith.constant 0 : index
    %c0_42 = arith.constant 0 : index
    %51 = vector.load %arg15[%c0_40, %c0_41, %c0_42] : memref<1x8x128xf32, #tpu.memory_space<vmem>>, vector<1x8x128xf32>
    %52 = vector.shape_cast %51 : vector<1x8x128xf32> to vector<8x128xf32>
    %53 = vector.shape_cast %50 : vector<8x128xf32> to vector<1x8x128xf32>
    tpu.vector_store %arg15[%c0_40, %c0_41, %c0_42], %53 {strides = array<i32>} : memref<1x8x128xf32, #tpu.memory_space<vmem>>, vector<1x8x128xf32>,
    return
  }
  func.func @transform_0(%arg0: i32) -> (i32, i32, i32) {
    %c0_i32 = arith.constant 0 : i32
    %c0_i32_0 = arith.constant 0 : i32
    %c0_i32_1 = arith.constant 0 : i32
    return %arg0, %c0_i32, %c0_i32_0 : i32, i32, i32
  }
  func.func @transform_1(%arg0: i32) -> (i32, i32, i32) {
    %c0_i32 = arith.constant 0 : i32
    %c0_i32_0 = arith.constant 0 : i32
    %c0_i32_1 = arith.constant 0 : i32
    return %arg0, %c0_i32, %c0_i32_0 : i32, i32, i32
  }
  func.func @transform_2(%arg0: i32) -> (i32, i32, i32) {
    %c0_i32 = arith.constant 0 : i32
    %c0_i32_0 = arith.constant 0 : i32
    %c0_i32_1 = arith.constant 0 : i32
    return %arg0, %c0_i32, %c0_i32_0 : i32, i32, i32
  }
  func.func @transform_3(%arg0: i32) -> (i32, i32) {
    %c0_i32 = arith.constant 0 : i32
    %c0_i32_0 = arith.constant 0 : i32
    %c0_i32_1 = arith.constant 0 : i32
    return %c0_i32, %c0_i32_0 : i32, i32
  }
  func.func @transform_4(%arg0: i32) -> (i32, i32) {
    %c0_i32 = arith.constant 0 : i32
    %c0_i32_0 = arith.constant 0 : i32
    %c0_i32_1 = arith.constant 0 : i32
    return %c0_i32, %c0_i32_0 : i32, i32
  }
  func.func @transform_5(%arg0: i32) -> (i32, i32) {
    %c0_i32 = arith.constant 0 : i32
    %c0_i32_0 = arith.constant 0 : i32
    %c0_i32_1 = arith.constant 0 : i32
    return %c0_i32, %c0_i32_0 : i32, i32
  }
  func.func @transform_6(%arg0: i32) -> (i32, i32) {
    %c0_i32 = arith.constant 0 : i32
    %c0_i32_0 = arith.constant 0 : i32
    %c0_i32_1 = arith.constant 0 : i32
    return %c0_i32, %c0_i32_0 : i32, i32
  }
  func.func @transform_7(%arg0: i32) -> (i32, i32) {
    %c0_i32 = arith.constant 0 : i32
    %c0_i32_0 = arith.constant 0 : i32
    %c0_i32_1 = arith.constant 0 : i32
    return %c0_i32, %c0_i32_0 : i32, i32
  }
  func.func @transform_8(%arg0: i32) -> (i32, i32) {
    %c0_i32 = arith.constant 0 : i32
    %c0_i32_0 = arith.constant 0 : i32
    %c0_i32_1 = arith.constant 0 : i32
    return %c0_i32, %c0_i32_0 : i32, i32
  }
  func.func @transform_9(%arg0: i32) -> (i32, i32) {
    %c0_i32 = arith.constant 0 : i32
    %c0_i32_0 = arith.constant 0 : i32
    %c0_i32_1 = arith.constant 0 : i32
    return %c0_i32, %c0_i32_0 : i32, i32
  }
  func.func @transform_10(%arg0: i32) -> (i32, i32) {
    %c0_i32 = arith.constant 0 : i32
    %c0_i32_0 = arith.constant 0 : i32
    %c0_i32_1 = arith.constant 0 : i32
    return %c0_i32, %c0_i32_0 : i32, i32
  }
  func.func @transform_11(%arg0: i32) -> (i32, i32) {
    %c0_i32 = arith.constant 0 : i32
    %c0_i32_0 = arith.constant 0 : i32
    %c0_i32_1 = arith.constant 0 : i32
    return %c0_i32, %c0_i32_0 : i32, i32
  }
  func.func @transform_12(%arg0: i32) -> (i32, i32) {
    %c0_i32 = arith.constant 0 : i32
    %c0_i32_0 = arith.constant 0 : i32
    %c0_i32_1 = arith.constant 0 : i32
    return %c0_i32, %c0_i32_0 : i32, i32
  }
  func.func @transform_13(%arg0: i32) -> (i32, i32, i32) {
    %c0_i32 = arith.constant 0 : i32
    %c0_i32_0 = arith.constant 0 : i32
    %c0_i32_1 = arith.constant 0 : i32
    return %arg0, %c0_i32, %c0_i32_0 : i32, i32, i32
  }
  func.func @transform_14(%arg0: i32) -> (i32, i32, i32) {
    %c0_i32 = arith.constant 0 : i32
    %c0_i32_0 = arith.constant 0 : i32
    %c0_i32_1 = arith.constant 0 : i32
    return %arg0, %c0_i32, %c0_i32_0 : i32, i32, i32
  }
}

</mosaic_0001>

<bundles_post_ra>
// kernel: forecast_blur_denoise_forward.1
= control target key start
LH: loop header
LB: loop body
LE: loop exit
PB: predicated region body
PF: predicated region fallthrough
CT: control target
= control target key end

     0   :  { %s2211_s0 = inlined_call_operand.vmem [shape: f32[2,16,16], index: 0, kind: input, shape index: {}]   ;;  %s2212_s1 = inlined_call_operand.vmem [shape: f32[2,4,16], index: 1, kind: input, shape index: {}]   ;;  %s2213_s2 = inlined_call_operand.vmem [shape: f32[2,4,128], index: 2, kind: input, shape index: {}]   ;;  %s2214_s3 = inlined_call_operand.vmem [shape: f32[16,32], index: 3, kind: input, shape index: {}]   ;;  %s2215_s4 = inlined_call_operand.hbm [shape: f32[1,32], index: 4, kind: input, shape index: {}]   ;;  %s2216_s5 = inlined_call_operand.hbm [shape: f32[16,32], index: 5, kind: input, shape index: {}]   ;;  %s2217_s6 = inlined_call_operand.hbm [shape: f32[1,32], index: 6, kind: input, shape index: {}]   ;;  %s2218_s7 = inlined_call_operand.hbm [shape: f32[32,32], index: 7, kind: input, shape index: {}]   ;;  %s2219_s8 = inlined_call_operand.hbm [shape: f32[1,32], index: 8, kind: input, shape index: {}]   ;;  %s2220_s9 = inlined_call_operand.hbm [shape: f32[32,32], index: 9, kind: input, shape index: {}]   ;;  %s2221_s10 = inlined_call_operand.hbm [shape: f32[1,32], index: 10, kind: input, shape index: {}]   ;;  %s2222_s11 = inlined_call_operand.hbm [shape: f32[32,128], index: 11, kind: input, shape index: {}]   ;;  %s2223_s12 = inlined_call_operand.hbm [shape: f32[1,128], index: 12, kind: input, shape index: {}]   ;;  %s2224_s13 = inlined_call_operand.hbm [shape: f32[2,4,128], index: 13, kind: output, shape index: {0}]   ;;  %s2225_s14 = inlined_call_operand.vmem [shape: f32[2,8,128], index: 14, kind: output, shape index: {1}]  }
   0x1   :  { %2234 = sst [smem:[#allocation30_spill]] %s2216_s5 }
   0x2   :  { %20 = vsyncpa [#allocation3], 0 }
   0x3   :  { %21 = vsyncpa [#allocation6], 0 }
   0x4   :  { %22 = vsyncpa [#allocation9], 0 }
   0x5   :  { %23 = vsyncpa [#allocation12], 0 }
   0x6   :  { %24 = vsyncpa [#allocation15], 0 }
   0x7   :  { %25 = vsyncpa [#allocation4], 0 }
   0x8   :  { %27 = vsyncpa [#allocation4 + $0x1], 0  ;;  %s1972_s29 = smov 0   ;;  %s1974_s30 = smov 0  }
   0x9   :  { %s1976_s15 = smov 0   ;;  %s1978_s16 = smov 0  }
   0xa LB: > { %2235 = sst [smem:[#allocation24_spill]] %s1869_s29  ;;  %s1993_s17 = sadd.s32 4294967295, %s1881_s16   ;;  %s1881_s16 = sphi %s1978_s16, %s2262_s16   ;;  %s1877_s15 = sphi %s1976_s15, %s2267_s15   ;;  %s1873_s30 = sphi %s1974_s30, %s2266_s30   ;;  %s1869_s29 = sphi %s1972_s29, %s2265_s29  }
   0xb   : > { %2236 = sst [smem:[#allocation25_spill]] %s1877_s15  ;;  %s1316_s18 = sadd.s32 4294967294, %s1881_s16  }
   0xc   : > { %2237 = sst [smem:[#allocation26_spill]] %s1881_s16  ;;  %s1997_s19 = sadd.s32 1, %s1881_s16  }
   0xd   : > { %2238 = sst [smem:[#allocation27_spill]] %s1997_s19  ;;  %s328_s20 = sadd.s32 1, %s1877_s15 }
   0xe   : > { %s325_s21 = ssub.s32 %s1881_s16, %s1997_s19  ;;  %p338_p0 = scmp.ne.s32.totalorder %s1877_s15, %s1873_s30 }
   0xf   : > { %p326_p1 = scmp.eq.s32.totalorder %s325_s21, 0  ;;  %p339_p2 = scmp.eq.s32.totalorder %s1993_s17, 1 }
  0x10   : > { %p344_p3 = scmp.ne.s32.totalorder %s1873_s30, %s1869_s29  ;;  %p345_p4 = scmp.eq.s32.totalorder %s1316_s18, 1 }
  0x11   : > { %s2008_s22 = scalar_select %p326_p1, %s1877_s15, %s328_s20  }
  0x12   : > { %p2010_p5 = por %p339_p2, %p338_p0  ;;  %p2014_p6 = por %p345_p4, %p344_p3 }
  0x13   : > { %2239 = sst [smem:[#allocation28_spill]] %s2008_s22  ;;  %p1317_p7 = scmp.ge.s32.totalorder %s1881_s16, 1 }
  0x14   : > { %s2240_s23 = scalar_select %p2010_p5, 1, 0 }
  0x15   : > { %s2241_s24 = scalar_select %p2014_p6, 1, 0 }
  0x16   : > { %p378_p8 = scmp.lt.s32.totalorder %s1881_s16, 3  ;;  %p2232_p9 = scmp.eq.s32.totalorder %s1993_s17, 0 }
  0x17   : > { %2242 = sst [smem:[#allocation29_spill]] %s2241_s24  ;;  %s1883_s26 = smov [#allocation5]  }
  0x18   : > { %p2021_p10 = pnand %p1317_p7, %p378_p8  ;;  %s404_s27 = sshll.u32 %s1883_s26, 4  ;;  %s405_s27 = int_to_ptr.vmem [resolvable:$true] %s404_s27 }
  0x19   : > { %s1884_s18 = smov [#allocation8]   ;;  %s1885_s21 = smov [#allocation11]  }
  0x1a   : > { %p1471_p11 = pneg %p2021_p10  ;;  %s428_s20 = sshll.u32 %s1884_s18, 4  ;;  %s429_s20 = int_to_ptr.vmem [resolvable:$true] %s428_s20 }
  0x1b   : > { %s452_s22 = sshll.u32 %s1885_s21, 4  ;;  %s1578_s26 = scalar_lea.vmem %s405_s27, 256  ;;  %s453_s22 = int_to_ptr.vmem [resolvable:$true] %s452_s22 }
  0x1c   : > { %p2029_p12 = pnand %p2232_p9, %p1471_p11  ;;  %p1579_p0 = scmp.ne.s32.totalorder %s405_s27, %s1578_s26 }
  0x1d   : > { %p1586_p3 = scmp.lt.s32.totalorder %s405_s27, %s405_s27  ;;  %p1587_p4 = scmp.lt.s32.totalorder %s1578_s26, %s1578_s26 }
  0x1e   : > { %p2035_p13 = pneg %p2029_p12 }
  0x1f   : > { %p1588_p7 = por %p1587_p4, %p1586_p3 }
  0x20   : > { %p1581_p1 = pnand %p1579_p0, %p2035_p13 }
  0x22   : > { %p1582_p2 = pneg %p1581_p1 }
  0x24   : > { %p1589_p8 = pnand %p1588_p7, %p1582_p2 }
  0x26   : > { %1592 = shalt.err (!%p1589_p8)
}
  0x27   : > { %s1886_s18 = smov 128   ;;  %s1887_s21 = smov 8  }
  0x28   : > { %s2246_s5 = sld [smem:[#allocation30_spill]]  ;;  %s1604_s29 = scalar_lea.vmem %s429_s20, 512 }
  0x29   : > { %p1605_p11 = scmp.ne.s32.totalorder %s429_s20, %s1604_s29  ;;  %p1612_p3 = scmp.lt.s32.totalorder %s429_s20, %s429_s20 }
  0x2a   : > { %p1613_p2 = scmp.lt.s32.totalorder %s1604_s29, %s1604_s29 }
  0x2b   : > { %p1607_p0 = pnand %p1605_p11, %p2035_p13 }
  0x2c   : > { %p1614_p4 = por %p1613_p2, %p1612_p3 }
  0x2d   : > { %p1608_p1 = pneg %p1607_p0 }
  0x2e   : > { %1477 = dma.hbm_to_vmem [thread:$0]  (!%p2029_p12), %s2246_s5, 256, %s405_s27, [#allocation6], %s1886_s18, %s1886_s18, %s1887_s21  }
  0x2f   : > { %p1615_p7 = pnand %p1614_p4, %p1608_p1 }
  0x31   : > { %1618 = shalt.err (!%p1615_p7)
}
  0x32   : > { %1483 = dma.hbm_to_vmem [thread:$0]  (!%p2029_p12), %s2218_s7, 512, %s429_s20, [#allocation9], %s1886_s18, %s1886_s18, %s1887_s21  }
  0x33   : > { %s1630_s19 = scalar_lea.vmem %s453_s22, 512  ;;  %p1638_p9 = scmp.lt.s32.totalorder %s453_s22, %s453_s22 }
  0x34   : > { %p1631_p8 = scmp.ne.s32.totalorder %s453_s22, %s1630_s19  ;;  %p1639_p3 = scmp.lt.s32.totalorder %s1630_s19, %s1630_s19 }
  0x36   : > { %p1633_p11 = pnand %p1631_p8, %p2035_p13  ;;  %p1640_p1 = por %p1639_p3, %p1638_p9 }
  0x38   : > { %p1634_p0 = pneg %p1633_p11 }
  0x3a   : > { %p1641_p2 = pnand %p1640_p1, %p1634_p0 }
  0x3c   : > { %1644 = shalt.err (!%p1641_p2)
}
  0x3d   : > { %1489 = dma.hbm_to_vmem [thread:$0]  (!%p2029_p12), %s2220_s9, 512, %s453_s22, [#allocation12], %s1886_s18, %s1886_s18, %s1887_s21  }
  0x3e   : > { %s1888_s24 = smov [#allocation14]   ;;  %s1889_s20 = smov [#allocation2]  }
  0x3f   : > { %s476_s27 = sshll.u32 %s1888_s24, 4  ;;  %s394_s26 = sshll.u32 %s1889_s20, 4  ;;  %s477_s27 = int_to_ptr.vmem [resolvable:$true] %s476_s27  ;;  %s395_s26 = int_to_ptr.vmem [resolvable:$true] %s394_s26 }
  0x40   : > { %s1656_s5 = scalar_lea.vmem %s477_s27, 512  ;;  %p1664_p8 = scmp.lt.s32.totalorder %s477_s27, %s477_s27 }
  0x41   : > { %p1657_p4 = scmp.ne.s32.totalorder %s477_s27, %s1656_s5  ;;  %p1665_p11 = scmp.lt.s32.totalorder %s1656_s5, %s1656_s5 }
  0x43   : > { %p1659_p9 = pnand %p1657_p4, %p2035_p13  ;;  %p1666_p0 = por %p1665_p11, %p1664_p8 }
  0x45   : > { %p1660_p7 = pneg %p1659_p9 }
  0x47   : > { %p1667_p3 = pnand %p1666_p0, %p1660_p7 }
  0x49   : > { %1670 = shalt.err (!%p1667_p3)
}
  0x4a   : > { %1495 = dma.hbm_to_vmem [thread:$0]  (!%p2029_p12), %s2222_s11, 512, %s477_s27, [#allocation15], %s1886_s18, %s1886_s18, %s1887_s21  }
  0x4b   : > { %s1682_s29 = scalar_lea.vmem %s395_s26, 16  ;;  %s1689_s5 = scalar_lea.vmem %s395_s26, 32 }
  0x4c   : > { %p1683_p1 = scmp.ne.s32.totalorder %s395_s26, %s1682_s29  ;;  %p1690_p9 = scmp.lt.s32.totalorder %s395_s26, %s395_s26 }
  0x4d   : > { %p1691_p7 = scmp.lt.s32.totalorder %s1689_s5, %s1682_s29 }
  0x4e   : > { %p1685_p2 = pnand %p1683_p1, %p2035_p13 }
  0x4f   : > { %p1692_p8 = por %p1691_p7, %p1690_p9 }
  0x50   : > { %p1686_p4 = pneg %p1685_p2 }
  0x52   : > { %p1693_p11 = pnand %p1692_p8, %p1686_p4 }
  0x54   : > { %1696 = shalt.err (!%p1693_p11)
}
  0x55   : > { %1474 = dma.hbm_to_vmem [thread:$0]  (!%p2029_p12), %s2215_s4, 16, %s395_s26, [#allocation3]  }
  0x56   : > { %s1890_s18 = smov [#allocation7]   ;;  %s1891_s27 = smov [#allocation10]  }
  0x57   : > { %s418_s21 = sshll.u32 %s1890_s18, 4  ;;  %s442_s20 = sshll.u32 %s1891_s27, 4  ;;  %s419_s21 = int_to_ptr.vmem [resolvable:$true] %s418_s21  ;;  %s443_s20 = int_to_ptr.vmem [resolvable:$true] %s442_s20 }
  0x58   : > { %s1708_s22 = scalar_lea.vmem %s419_s21, 16  ;;  %s1715_s19 = scalar_lea.vmem %s419_s21, 32 }
  0x59   : > { %p1709_p0 = scmp.ne.s32.totalorder %s419_s21, %s1708_s22  ;;  %p1716_p2 = scmp.lt.s32.totalorder %s419_s21, %s419_s21 }
  0x5a   : > { %p1717_p4 = scmp.lt.s32.totalorder %s1715_s19, %s1708_s22 }
  0x5b   : > { %p1711_p3 = pnand %p1709_p0, %p2035_p13 }
  0x5c   : > { %p1718_p9 = por %p1717_p4, %p1716_p2 }
  0x5d   : > { %p1712_p1 = pneg %p1711_p3 }
  0x5f   : > { %p1719_p7 = pnand %p1718_p9, %p1712_p1 }
  0x61   : > { %1722 = shalt.err (!%p1719_p7)
}
  0x62   : > { %1480 = dma.hbm_to_vmem [thread:$0]  (!%p2029_p12), %s2217_s6, 16, %s419_s21, [#allocation6]  }
  0x63   : > { %s1734_s5 = scalar_lea.vmem %s443_s20, 16  ;;  %s1741_s16 = scalar_lea.vmem %s443_s20, 32 }
  0x64   : > { %p1735_p8 = scmp.ne.s32.totalorder %s443_s20, %s1734_s5  ;;  %p1742_p3 = scmp.lt.s32.totalorder %s443_s20, %s443_s20 }
  0x65   : > { %p1743_p6 = scmp.lt.s32.totalorder %s1741_s16, %s1734_s5 }
  0x66   : > { %p1737_p11 = pnand %p1735_p8, %p2035_p13 }
  0x67   : > { %p1744_p5 = por %p1743_p6, %p1742_p3 }
  0x68   : > { %p1738_p0 = pneg %p1737_p11 }
  0x6a   : > { %p1745_p2 = pnand %p1744_p5, %p1738_p0 }
  0x6c   : > { %1748 = shalt.err (!%p1745_p2)
}
  0x6d   : > { %1486 = dma.hbm_to_vmem [thread:$0]  (!%p2029_p12), %s2219_s8, 16, %s443_s20, [#allocation9]  }
  0x6e   : > { %s1892_s21 = smov [#allocation13]   ;;  %s1893_s22 = smov [#allocation16]  }
  0x6f   : > { %s466_s27 = sshll.u32 %s1892_s21, 4  ;;  %s490_s19 = sshll.u32 %s1893_s22, 4  ;;  %s467_s27 = int_to_ptr.vmem [resolvable:$true] %s466_s27  ;;  %s491_s19 = int_to_ptr.vmem [resolvable:$true] %s490_s19 }
  0x70   : > { %s1760_s29 = scalar_lea.vmem %s467_s27, 16  ;;  %s1767_s26 = scalar_lea.vmem %s467_s27, 32 }
  0x71   : > { %p1761_p1 = scmp.ne.s32.totalorder %s467_s27, %s1760_s29  ;;  %p1768_p5 = scmp.lt.s32.totalorder %s467_s27, %s467_s27 }
  0x72   : > { %p1769_p6 = scmp.lt.s32.totalorder %s1767_s26, %s1760_s29 }
  0x73   : > { %p1763_p4 = pnand %p1761_p1, %p2035_p13 }
  0x74   : > { %p1770_p7 = por %p1769_p6, %p1768_p5 }
  0x75   : > { %p1764_p9 = pneg %p1763_p4 }
  0x77   : > { %p1771_p8 = pnand %p1770_p7, %p1764_p9 }
  0x79   : > { %1774 = shalt.err (!%p1771_p8)
}
  0x7a   : > { %1492 = dma.hbm_to_vmem [thread:$0]  (!%p2029_p12), %s2221_s10, 16, %s467_s27, [#allocation12]  }
  0x7b   : > { %s1786_s16 = scalar_lea.vmem %s491_s19, 16  ;;  %s1793_s24 = scalar_lea.vmem %s491_s19, 32 }
  0x7c   : > { %p1787_p11 = scmp.ne.s32.totalorder %s491_s19, %s1786_s16  ;;  %p1794_p2 = scmp.lt.s32.totalorder %s491_s19, %s491_s19 }
  0x7d   : > { %p1795_p1 = scmp.lt.s32.totalorder %s1793_s24, %s1786_s16 }
  0x7e   : > { %p1789_p0 = pnand %p1787_p11, %p2035_p13 }
  0x7f   : > { %p1796_p4 = por %p1795_p1, %p1794_p2 }
  0x80   : > { %p1790_p3 = pneg %p1789_p0 }
  0x82   : > { %p1797_p5 = pnand %p1796_p4, %p1790_p3 }
  0x84   : > { %1800 = shalt.err (!%p1797_p5)
}
  0x85   : > { %1498 = dma.hbm_to_vmem [thread:$0]  (!%p2029_p12), %s2223_s12, 16, %s491_s19, [#allocation15]  }
  0x86   : > { %525 = sbr.rel (%p2021_p10) target bundleno = 978 (0x3d2), region = 72  ;;  %p2247_p9 = scmp.eq.s32.totalorder (!%p2021_p10), %s1993_s17, 0 }
  0x8b   : > { %1844 = dma.done.wait (%p2247_p9), [#allocation3], 16   ;;  %p2248_p13 = pmov %p2247_p9 }
  0x8c   : > { %p2249_p6 = pmov %p2247_p9 }
  0x8d   : > { %1846 = vsyncadd (%p2248_p13), [#allocation3], 4294967280 }
  0x8e   : > { %1848 = dma.done.wait (%p2249_p6), [#allocation6], 272   ;;  %p2250_p7 = pmov %p2249_p6 }
  0x8f   : > { %p2251_p8 = pmov %p2249_p6 }
  0x90   : > { %1850 = vsyncadd (%p2250_p7), [#allocation6], 4294967024 }
  0x91   : > { %1852 = dma.done.wait (%p2251_p8), [#allocation9], 528   ;;  %p2252_p12 = pmov %p2249_p6 }
  0x92   : > { %p2253_p10 = pmov %p2249_p6 }
  0x93   : > { %1854 = vsyncadd (%p2252_p12), [#allocation9], 4294966768 }
  0x94   : > { %1856 = dma.done.wait (%p2253_p10), [#allocation12], 528   ;;  %p2254_p11 = pmov %p2249_p6 }
  0x95   : > { %p2255_p0 = pmov %p2249_p6 }
  0x96   : > { %1858 = vsyncadd (%p2254_p11), [#allocation12], 4294966768 }
  0x97   : > { %1860 = dma.done.wait (%p2255_p0), [#allocation15], 528   ;;  %p2256_p3 = pmov %p2255_p0 }
  0x98   : > { %p615_p2 = scmp.lt.s32.totalorder %s1993_s17, 1  ;;  %vm644_vm0 = vcmask 130048   ;;  %v636_v0 = vld [vmem:[%s2214_s3 + $0x8] sm:$0xff]  ;;  %v635_v1 = vld [vmem:[%s2214_s3] sm:$0xff]  ;;  %v1894_v6 = vmov 0.0   ;;  %vm1895_vm1 = vmmov 0  }
  0x99   : > { %1862 = vsyncadd (%p2256_p3), [#allocation15], 4294966768  ;;  %1384 = vmatprep.subr.mxu1 %v636_v0  ;;  %v811_v4 = vld [vmem:[#allocation8 + $0x18] sm:$0xff]  ;;  %v726_v7 = vld [vmem:[#allocation5] sm:$0xff]  ;;  %vm819_vm2 = vcmask 261120   ;;  %s606_s21 = sand.u32 1, %s1873_s30  }
  0x9a   : > { %s2138_s15 = scalar_select %p615_p2, %s1993_s17, 1  ;;  %1385 = vmatpush3.msra.mxu1 %v636_v0  ;;  %v727_v5 = vld [vmem:[#allocation5 + $0x8] sm:$0xff]  ;;  %1398 = vmatprep.subr.mxu0 %v811_v4  ;;  %v809_v10 = vld [vmem:[#allocation8 + $0x8] sm:$0xff]  ;;  %v808_v11 = vld [vmem:[#allocation8] sm:$0xff]  ;;  %vm1087_vm3 = vcmask 1043456  }
  0x9b   : > { %1386 = vmatprep.subr.mxu1 %v635_v1  ;;  %1399 = vmatpush3.msra.mxu0 %v811_v4  ;;  %v810_v9 = vld [vmem:[#allocation8 + $0x10] sm:$0xff]  ;;  %v916_v12 = vld [vmem:[#allocation11 + $0x18] sm:$0xff]  ;;  %v913_v15 = vld [vmem:[#allocation11] sm:$0xff]  ;;  %s1357_s29 = sshll.u32 %s1993_s17, 6  ;;  %p2257_p4 = scmp.ne.s32.totalorder %s2240_s23, 0 }
  0x9c   : > { %s1360_s25 = sshll.u32 %s2138_s15, 4  ;;  %s1341_s20 = sshll.u32 %s2138_s15, 2  ;;  %1387 = vmatpush3.msra.mxu1 %v635_v1  ;;  %1400 = vmatprep.subr.mxu0 %v810_v9  ;;  %v915_v13 = vld [vmem:[#allocation11 + $0x10] sm:$0xff]  ;;  %v914_v14 = vld [vmem:[#allocation11 + $0x8] sm:$0xff]  ;;  %v1347_v19 = vld [vmem:[#allocation7] ss:$0 sm:$0xff] }
  0x9d   : > { %s619_s22 = scalar_lea.vmem %s2211_s0, %s1360_s25  ;;  %s623_s18 = scalar_lea.vmem %s2212_s1, %s1341_s20  ;;  %1391 = vmatprep.subr.mxu1 %v1894_v6  ;;  %1401 = vmatpush3.msra.mxu0 %v810_v9  ;;  %v1344_v17 = vld [vmem:[#allocation2] ss:$0 sm:$0xff]  ;;  %v1002_v25 = vld [vmem:[#allocation14 + $0x18] sm:$0xff]  ;;  %v1001_v26 = vld [vmem:[#allocation14 + $0x10] sm:$0xff] }
  0x9e   : > { %v632_v2 = vld [vmem:[%s619_s22] sm:$0xff]  ;;  %v633_v3 = vld [vmem:[%s619_s22 + $0x8] sm:$0xff]  ;;  %1402 = vmatprep.subr.mxu0 %v809_v10  ;;  %v999_v28 = vld [vmem:[#allocation14] sm:$0xff]  ;;  %s1338_s25 = sshll.u32 %s606_s21, 2  ;;  %s627_s22 = scalar_lea.vmem %s2213_s2, %s1341_s20 }
  0x9f   : > { %1388 = vmatprep.mubr.msk.f32.mxu1 %vm644_vm0, %v632_v2  ;;  %v634_v8 = vld [vmem:[%s623_s18] sm:$0xf]  ;;  %1403 = vmatpush3.msra.mxu0 %v809_v10  ;;  %v1349_v29 = vld [vmem:[#allocation10] ss:$0 sm:$0xff]  ;;  %v1352_v43 = vld [vmem:[#allocation13] ss:$0 sm:$0xff]  ;;  %s1116_s24 = scalar_lea.hbm %s2224_s13, %s1357_s29 }
  0xa0   : > { %1389 = vmatmul.mubr.msk.f32.vlgmr.msra.gmra.mxu1 %vm644_vm0, %v633_v3  ;;  %1404 = vmatprep.subr.mxu0 %v808_v11  ;;  %v1000_v27 = vld [vmem:[#allocation14 + $0x8] sm:$0xff]  ;;  %v1354_v52 = vld [vmem:[#allocation16] ss:$0 sm:$0xff]  ;;  %s608_s19 = scalar_lea.vmem [#allocation17], %s1338_s25  ;;  %s1101_s20 = scalar_lea.sflag [#allocation4], %s606_s21 }
  0xa1   : > { %1392 = vmatpush3.msra.mxu1 %v727_v5  ;;  %1395 = vmatprep.mubr.msk.f32.mxu1 %vm1895_vm1, %v1894_v6  ;;  %v1084_v54 = vld [vmem:[%s627_s22] sm:$0xf]  ;;  %s1118_s26 = sshll.u32 %s608_s19, 4  ;;  %s1896_s25 = smov [#allocation17]   ;;  %s1119_s26 = int_to_ptr.vmem [resolvable:$true] %s1118_s26 }
  0xa2   : > { %1393 = vmatprep.subr.mxu1 %v1894_v6  ;;  %1405 = vmatpush3.msra.mxu0 %v808_v11  ;;  %s1801_s18 = scalar_lea.vmem %s1119_s26, 64  ;;  %s1805_s28 = sshll.u32 %s1896_s25, 4  ;;  %s1806_s28 = int_to_ptr.vmem [resolvable:$false] %s1805_s28 }
  0xa3   : > { %1394 = vmatpush3.msra.mxu1 %v726_v7  ;;  %1420 = vmatprep.subr.mxu0 %v1894_v6  ;;  %p1802_p1 = scmp.ne.s32.totalorder %s1119_s26, %s1801_s18  ;;  %s1807_s27 = scalar_lea.vmem %s1806_s28, 128 }
  0xa4   : > { %1396 = vmatmul.mubr.msk.f32.vlgmr.msra.gmra.mxu1 %vm644_vm0, %v634_v8  ;;  %1409 = vmatprep.subr.mxu1 %v1894_v6  ;;  %p1808_p13 = scmp.lt.s32.totalorder %s1119_s26, %s1806_s28  ;;  %p1809_p6 = scmp.lt.s32.totalorder %s1807_s27, %s1801_s18 }
  0xa5   : > { %1417 = vmatprep.mubr.msk.f32.mxu1 %vm1895_vm1, %v1894_v6  ;;  %1410 = vmatpush3.msra.mxu1 %v916_v12  ;;  %p1803_p5 = pnand %p1802_p1, %p2257_p4 }
  0xa6   : > { %1411 = vmatprep.subr.mxu1 %v1894_v6  ;;  %p1810_p7 = por %p1809_p6, %p1808_p13 }
  0xa7   : > { %1412 = vmatpush3.msra.mxu1 %v915_v13  ;;  %p1804_p9 = pneg %p1803_p5 }
  0xa8   : > { %1413 = vmatprep.subr.mxu1 %v1894_v6 }
  0xa9   : > { %1414 = vmatpush3.msra.mxu1 %v914_v14  ;;  %p1811_p8 = pnand %p1810_p7, %p1804_p9 }
  0xaa   : > { %1415 = vmatprep.subr.mxu1 %v1894_v6 }
  0xab   : > { %1416 = vmatpush3.msra.mxu1 %v913_v15 }
 0x160   : > { %v1390_v16 = vpop.f32.mrf.mxu1 }
 0x161   : > { %v723_v21 = vadd.f32 %v1390_v16, %v1344_v17 }
 0x162   : > { %v717_v18 = vpop.f32.mrf.mxu1 }
 0x163   : > { %v718_v20 = vadd.f32 %v1344_v17, %v717_v18 }
 0x164   : > { %v804_v22 = vpop.f32.mrf.mxu1 }
 0x165   : > { %1406 = vmatprep.mubr.msk.f32.mxu0 %vm819_vm2, %v718_v20  ;;  %v805_v23 = vadd.f32 %v1347_v19, %v804_v22 }
 0x166   : > { %1407 = vmatmul.mubr.msk.f32.vlgmr.msra.gmra.mxu0 %vm819_vm2, %v723_v21  ;;  %v1397_v24 = vpop.f32.mrf.mxu1 }
 0x167   : > { %1418 = vmatmul.mubr.msk.f32.vlgmr.msra.gmra.mxu1 %vm819_vm2, %v805_v23  ;;  %1428 = vmatprep.mubr.msk.f32.mxu0 %vm1895_vm1, %v1894_v6 }
 0x168   : > { %1421 = vmatpush3.msra.mxu0 %v1002_v25 }
 0x169   : > { %1422 = vmatprep.subr.mxu0 %v1894_v6 }
 0x16a   : > { %1423 = vmatpush3.msra.mxu0 %v1001_v26 }
 0x16b   : > { %1424 = vmatprep.subr.mxu0 %v1894_v6 }
 0x16c   : > { %1425 = vmatpush3.msra.mxu0 %v1000_v27 }
 0x16d   : > { %1426 = vmatprep.subr.mxu0 %v1894_v6 }
 0x16e   : > { %1427 = vmatpush3.msra.mxu0 %v999_v28 }
 0x226   : > { %v1408_v30 = vpop.f32.mrf.mxu0 }
 0x227   : > { %v898_v31 = vadd.f32 %v1408_v30, %v1349_v29  ;;  %v993_v32 = vpop.f32.mrf.mxu1 }
 0x228   : > { %v892_v33 = vpop.f32.mrf.mxu0  ;;  %v994_v46 = vadd.f32 %v1352_v43, %v993_v32 }
 0x229   : > { %v902_v34 = vmax.f32 %v898_v31, 0.0  ;;  %v893_v35 = vadd.f32 %v1349_v29, %v892_v33  ;;  %v1419_v36 = vpop.f32.mrf.mxu1 }
 0x22a   : > { %v997_v49 = vmax.f32 %v994_v46, 0.0 }
 0x22b   : > { %v901_v37 = vmax.f32 %v893_v35, 0.0  ;;  %v904_v38 = vsel %vm819_vm2, %v902_v34, 0.0 }
 0x22d   : > { %v903_v39 = vsel %vm819_vm2, %v901_v37, 0.0 }
 0x22e   : > { %v905_v40 = vadd.f32 %v904_v38, %v903_v39 }
 0x230   : > { %v906_v41 = vrot.slane %v905_v40, 4 }
 0x232   : > { %v907_v42 = vadd.f32 %v906_v41, %v905_v40 }
 0x234   : > { %v908_v44 = vrot.slane %v907_v42, 2 }
 0x236   : > { %v909_v45 = vadd.f32 %v908_v44, %v907_v42 }
 0x238   : > { %v910_v47 = vrot.slane %v909_v45, 1 }
 0x23a   : > { %v911_v48 = vadd.f32 %v910_v47, %v909_v45 }
 0x23c   : > { %v912_v50 = vmul.f32 0.0625, %v911_v48 }
 0x23e   : > { %v998_v51 = vadd.f32 %v997_v49, %v912_v50 }
 0x240   : > { %1429 = vmatmul.mubr.msk.f32.vlgmr.msra.gmra.mxu0 %vm819_vm2, %v998_v51 }
 0x300   : > { %v1079_v53 = vpop.f32.mrf.mxu0 }
 0x301   : > { %v1080_v55 = vadd.f32 %v1354_v52, %v1079_v53 }
 0x302   : > { %v1430_v56 = vpop.f32.mrf.mxu0 }
 0x303   : > { %1083 = vst [vmem:[%s608_s19] sm:$0xf] %v1080_v55  ;;  %v1085_v57 = vsub.f32 %v1084_v54, %v1080_v55 }
 0x305   : > { %v1086_v58 = vmul.f32 %v1085_v57, %v1085_v57 }
 0x307   : > { %v1088_v59 = vsel %vm1087_vm3, %v1086_v58, 0.0 }
 0x308   : > { %1089 = vadd.xlane.f32.xlu0 %v1088_v59 }
 0x309   : > { %1814 = shalt.err (!%p1811_p8)
}
 0x30a   : > { %s1815_s17 = scalar_lea.hbm %s1116_s24, 64  ;;  %s1819_s19 = scalar_lea.hbm %s2224_s13, 128 }
 0x30b   : > { %p1816_p12 = scmp.ne.s32.totalorder %s1116_s24, %s1815_s17  ;;  %p1820_p0 = scmp.lt.s32.totalorder %s1116_s24, %s2224_s13 }
 0x30c   : > { %p1821_p3 = scmp.lt.s32.totalorder %s1819_s19, %s1815_s17 }
 0x30d   : > { %p1817_p10 = pnand %p1816_p12, %p2257_p4 }
 0x30e   : > { %p1822_p2 = por %p1821_p3, %p1820_p0 }
 0x30f   : > { %p1818_p11 = pneg %p1817_p10 }
 0x311   : > { %p1823_p1 = pnand %p1822_p2, %p1818_p11 }
 0x313   : > { %1826 = shalt.err (!%p1823_p1)
}
 0x314   : > { %1469 = dma.vmem_to_hbm [thread:$0]  (%p2257_p4), %s1119_s26, 64, %s1116_s24, %s1101_s20  }
 0x315   : > { %s1343_s16 = sshll.u32 %s2138_s15, 3 }
 0x316   : > { %s631_s28 = scalar_lea.vmem %s2225_s14, %s1343_s16 }
 0x391   : > { %v1090_v60 = vpop.xlane.xlu0 %1089 }
 0x392   : > { %v1091_v61 = vrot.slane %v1090_v60, 4 }
 0x394   : > { %v1092_v62 = vadd.f32 %v1091_v61, %v1090_v60 }
 0x396   : > { %v1093_v63 = vrot.slane %v1092_v62, 2 }
 0x398   : > { %v1094_v0 = vadd.f32 %v1093_v63, %v1092_v62 }
 0x39a   : > { %v1095_v1 = vrot.slane %v1094_v0, 1 }
 0x39c   : > { %v1096_v2 = vadd.f32 %v1095_v1, %v1094_v0 }
 0x39e   : > { %1431 = vpush %v1096_v2 }
 0x3cf   : > { %s1432_s27 = spop %1431 }
 0x3d0   : > { %v1098_v3 = vstv %s1432_s27 }
 0x3d1   : > { %1099 = vst [vmem:[%s631_s28] sm:$0xff] %v1098_v3 }
 0x3d2 PF: > { %s2258_s23 = sld [smem:[#allocation26_spill]] }
 0x3d3   : > { %s2259_s17 = sld [smem:[#allocation24_spill]] }
 0x3d4   : > { %s2260_s26 = sld [smem:[#allocation29_spill]] }
 0x3d8   : > { %p1521_p4 = scmp.ge.s32.totalorder %s2258_s23, 2 }
 0x3d9   : > { %s1133_s24 = sand.u32 1, %s2259_s17  }
 0x3da   : > { %p2261_p5 = scmp.ne.s32.totalorder %s2260_s26, 0  ;;  %s1134_s20 = scalar_lea.sflag [#allocation4], %s1133_s24 }
 0x3dc   : > { %p1500_p9 = pnand %p1521_p4, %p2261_p5 }
 0x3de   : > { %p1501_p13 = pneg %p1500_p9 }
 0x3e0   : > { %1864 = dma.done.wait (%p1501_p13), %s1134_s20, 64  }
 0x3e1   : > { %1866 = vsyncadd (%p1501_p13), %s1134_s20, 4294967232  ;;  %s2262_s16 = sld [smem:[#allocation27_spill]]  ;;  %s2265_s29 = smov %s1873_s30 }
 0x3e2   : > { %s2263_s15 = sld [smem:[#allocation25_spill]] }
 0x3e3   : > { %s2264_s21 = sld [smem:[#allocation28_spill]] }
 0x3e7   : > { %p30_p6 = scmp.ge.s32.totalorder %s2262_s16, 4  }
 0x3e8   : > { %s2266_s30 = smov %s2263_s15 }
 0x3e9   : > { %s2267_s15 = smov %s2264_s21  ;;  %32 = sbr.rel (!%p30_p6) target bundleno = 10 (0xa), region = 162 }
 0x3ee   :  { %1146 = vsyncpa [#allocation3], 1 }
 0x3ef   :  { %1148 = vsyncpa [#allocation3 + $0x1], 1 }
 0x3f0   :  { %1149 = vsyncpa [#allocation6], 1 }
 0x3f1   :  { %1150 = vsyncpa [#allocation9], 1 }
 0x3f2   :  { %1151 = vsyncpa [#allocation12], 1 }
 0x3f3   :  { %1152 = vsyncpa [#allocation15], 1 }
 0x3f4   :  { %1153 = vsyncpa [#allocation4], 1 }
 0x3f5   :  { %1155 = vsyncpa [#allocation4 + $0x1], 1 }

</bundles_post_ra>
